<compile_context>
chip_gen: v6e
topology: v6e:2x2x1
jax: 0.10.0
libtpu: 0.0.40
codegen_flags: <defaults>
</compile_context>

<pallas_src>
import jax
import jax.numpy as jnp
from jax.experimental import pallas as pl
from jax.experimental.pallas import tpu as pltpu


# ------------------------------------------------------------------ kernel ----

def _dilated_causal_conv(h_f32, h_bf16, masks, w_ref, b_ref, kernel_size, dilation, T):
    """One causal dilated conv for a single (T, Cin) sequence.

    h_f32:  (T, Cin) f32 activation (canonical).
    h_bf16: (T, Cin) bf16, cast once by the caller (reused for the zero-shift tap).
    masks:  dict {shift -> (T, 1) f32 0/1 mask}, hoisted once per kernel.
    w_ref:  (K*Cin, Cout) bf16 weight ref (tap-major rows, channel-minor).
    b_ref:  (1, Cout) f32 bias ref.
    Returns (T, Cout) f32 pre-activation.
    """
    _, Cin = h_f32.shape

    def tap_input(s):
        if s == 0:
            return h_bf16
        rolled = pltpu.roll(h_f32, shift=s, axis=0)          # sublane rotate (XLU), f32
        return (rolled * masks[s]).astype(jnp.bfloat16)      # zero wrapped rows, cast once

    if Cin % 128 == 0:
        # Lane-aligned channels: one concatenated matmul (concat offsets are 128-aligned).
        parts, n_skipped = [], 0
        for j in range(kernel_size):
            s = (kernel_size - 1 - j) * dilation
            if s >= T:
                n_skipped += 1                               # tap never sees valid data
                continue
            parts.append(tap_input(s))
        xcat = parts[0] if len(parts) == 1 else jnp.concatenate(parts, axis=-1)
        w = w_ref[...]
        if n_skipped:
            w = w[n_skipped * Cin:, :]                       # static row slice: dead taps
        acc = jnp.dot(xcat, w, preferred_element_type=jnp.float32)
    else:
        # Small / unaligned channels: K per-tap dots into one f32 accumulator
        # (skips the lane-axis concat relayout and the full-slab temps).
        acc = None
        for j in range(kernel_size):
            s = (kernel_size - 1 - j) * dilation
            if s >= T:
                continue
            w_j = w_ref[j * Cin:(j + 1) * Cin, :]            # static slice of the ref
            d = jnp.dot(tap_input(s), w_j, preferred_element_type=jnp.float32)
            acc = d if acc is None else acc + d

    return acc + b_ref[...]


def _make_fused_tcn_kernel(layer_cfgs, kernel_size, T):
    """Builds the fused kernel body. `layer_cfgs` is static (dilation / has_skip)."""
    shifts = sorted({(kernel_size - 1 - j) * cfg["dilation"]
                     for cfg in layer_cfgs for j in range(kernel_size)})
    shifts = [s for s in shifts if 0 < s < T]

    def kernel(*args):
        x_ref = args[0]
        o_ref = args[-1]
        prefs = args[1:-1]

        # Hoisted once: integer time index + one 0/1 mask per unique shift.
        t_col = jax.lax.broadcasted_iota(jnp.int32, (T, 1), 0)
        masks = {s: (t_col >= s).astype(jnp.float32) for s in shifts}

        h = x_ref[...].astype(jnp.float32)                   # (T, C0), VMEM-resident

        idx = 0
        for cfg in layer_cfgs:
            d = cfg["dilation"]
            w1, b1, w2, b2 = prefs[idx:idx + 4]
            idx += 4
            h_bf = h.astype(jnp.bfloat16)                    # cast once, reused below
            a = jnp.maximum(
                _dilated_causal_conv(h, h_bf, masks, w1, b1, kernel_size, d, T), 0.0)
            a_bf = a.astype(jnp.bfloat16)
            a = jnp.maximum(
                _dilated_causal_conv(a, a_bf, masks, w2, b2, kernel_size, d, T), 0.0)
            if cfg["has_skip"]:
                sw, sb = prefs[idx:idx + 2]
                idx += 2
                res = jnp.dot(h_bf, sw[...],
                              preferred_element_type=jnp.float32) + sb[...]
            else:
                res = h
            h = jnp.maximum(a + res, 0.0)

        fc_w, fc_b = prefs[idx], prefs[idx + 1]

        # Last timestep = static row slice (no selection matrix, no gather).
        h_last = h[T - 1:T, :].astype(jnp.bfloat16)          # (1, C_last)
        logits = jnp.dot(h_last, fc_w[...],
                         preferred_element_type=jnp.float32) + fc_b[...]
        m = jnp.max(logits, axis=1, keepdims=True)
        e = jnp.exp(logits - m)
        o_ref[...] = e / jnp.sum(e, axis=1, keepdims=True)   # exact normalization

    return kernel


# ----------------------------------------------------------------- wrapper ----

def tcn_forward(x, block_params, fc_w, fc_b, kernel_size):
    """x: (B, T, input_size). Matches TCN.forward (inference). One fused pallas_call."""
    B, T, C0 = x.shape
    O = fc_w.shape[1]
    layer_cfgs = [dict(dilation=2 ** i, has_skip=p["has_skip"])
                  for i, p in enumerate(block_params)]

    inputs = [x]
    in_specs = [pl.BlockSpec((None, T, C0), lambda b: (b, 0, 0))]   # per-batch sequence

    def add_resident(a):
        # Constant index map -> weights stay VMEM-resident across grid steps.
        inputs.append(a)
        in_specs.append(pl.BlockSpec(a.shape, lambda b: (0, 0)))

    for p in block_params:
        for name in ("w1", "b1", "w2", "b2"):
            add_resident(p[name])
        if p["has_skip"]:
            add_resident(p["skip_w"])
            add_resident(p["skip_b"])
    add_resident(fc_w)
    add_resident(fc_b)

    kern = _make_fused_tcn_kernel(layer_cfgs, kernel_size, T)
    out3 = pl.pallas_call(
        kern,
        out_shape=jax.ShapeDtypeStruct((B, 1, O), jnp.float32),
        grid=(B,),
        in_specs=in_specs,
        out_specs=pl.BlockSpec((None, 1, O), lambda b: (b, 0, 0)),
        compiler_params=pltpu.CompilerParams(
            dimension_semantics=("parallel",),          # megacore: batches split over TCs
            vmem_limit_bytes=32 * 1024 * 1024,
        ),
    )(*inputs)
    return out3.reshape(B, O)


# --------------------------------------------------------- pure-JAX reference ---

def _ref_causal_conv(x_ntc, w_torch, b, dilation, cast_bf16):
    B, T, Cin = x_ntc.shape
    Cout, _, K = w_torch.shape
    y = jnp.zeros((B, T, Cout), jnp.float32)
    for j in range(K):
        s = (K - 1 - j) * dilation
        if s >= T:
            continue
        xs = jnp.pad(x_ntc, ((0, 0), (s, 0), (0, 0)))[:, :T, :]
        wj = w_torch[:, :, j]
        if cast_bf16:
            xs = xs.astype(jnp.bfloat16)
            wj = wj.astype(jnp.bfloat16)
        y = y + jnp.einsum("btc,oc->bto", xs, wj, preferred_element_type=jnp.float32)
    return y + b[None, None, :]


def _ref_forward(x, torch_params, fc_w_t, fc_b_t, kernel_size, cast_bf16=False):
    def mm(a, w_oc):
        if cast_bf16:
            a = a.astype(jnp.bfloat16)
            w_oc = w_oc.astype(jnp.bfloat16)
        return jnp.einsum("btc,oc->bto", a, w_oc, preferred_element_type=jnp.float32)

    h = x
    for i, p in enumerate(torch_params):
        d = 2 ** i
        a = jax.nn.relu(_ref_causal_conv(h, p["w1"], p["b1"], d, cast_bf16))
        a = jax.nn.relu(_ref_causal_conv(a, p["w2"], p["b2"], d, cast_bf16))
        if p["has_skip"]:
            res = mm(h, p["skip_w"][:, :, 0]) + p["skip_b"][None, None, :]
        else:
            res = h
        h = jax.nn.relu(a + res)
    h_last = h[:, -1, :]
    hl, wf = h_last, fc_w_t
    if cast_bf16:
        hl = hl.astype(jnp.bfloat16)
        wf = wf.astype(jnp.bfloat16)
    logits = jnp.dot(hl, wf.T, preferred_element_type=jnp.float32) + fc_b_t
    return jax.nn.softmax(logits, axis=1)


# --------------------------------------------------------------------- main ----

if __name__ == "__main__":
    B, T = 2, 16
    input_size = 8
    output_size = 4
    num_channels = [16, 16]
    kernel_size = 3

    key = jax.random.PRNGKey(0)

    torch_params = []   # PyTorch-layout params (for the reference)
    block_params = []   # kernel-layout params
    for i, out_c in enumerate(num_channels):
        in_c = input_size if i == 0 else num_channels[i - 1]
        key, k1, k2, k3, k4, k5, k6 = jax.random.split(key, 7)
        w1 = 0.2 * jax.random.normal(k1, (out_c, in_c, kernel_size), jnp.float32)
        b1 = 0.1 * jax.random.normal(k2, (out_c,), jnp.float32)
        w2 = 0.2 * jax.random.normal(k3, (out_c, out_c, kernel_size), jnp.float32)
        b2 = 0.1 * jax.random.normal(k4, (out_c,), jnp.float32)
        has_skip = in_c != out_c
        if has_skip:
            sw = 0.2 * jax.random.normal(k5, (out_c, in_c, 1), jnp.float32)
            sb = 0.1 * jax.random.normal(k6, (out_c,), jnp.float32)
        else:
            sw = jnp.zeros((out_c, in_c, 1), jnp.float32)
            sb = jnp.zeros((out_c,), jnp.float32)
        torch_params.append(dict(w1=w1, b1=b1, w2=w2, b2=b2,
                                 skip_w=sw, skip_b=sb, has_skip=has_skip))
        bp = dict(
            # (Cout, Cin, K) -> (K*Cin, Cout), tap-major rows, bf16 for the MXU
            w1=jnp.transpose(w1, (2, 1, 0)).reshape(kernel_size * in_c, out_c).astype(jnp.bfloat16),
            b1=b1.reshape(1, out_c),
            w2=jnp.transpose(w2, (2, 1, 0)).reshape(kernel_size * out_c, out_c).astype(jnp.bfloat16),
            b2=b2.reshape(1, out_c),
            has_skip=has_skip,
        )
        if has_skip:
            bp["skip_w"] = jnp.transpose(sw[:, :, 0]).astype(jnp.bfloat16)   # (Cin, Cout)
            bp["skip_b"] = sb.reshape(1, out_c)
        block_params.append(bp)

    key, kf1, kf2, kx = jax.random.split(key, 4)
    fc_w_t = 0.2 * jax.random.normal(kf1, (output_size, num_channels[-1]), jnp.float32)
    fc_b_t = 0.1 * jax.random.normal(kf2, (output_size,), jnp.float32)
    fc_w = fc_w_t.T.astype(jnp.bfloat16)          # (C_last, O) for the kernel
    fc_b = fc_b_t.reshape(1, output_size)

    x = jax.random.normal(kx, (B, T, input_size), jnp.float32)

    out = jax.block_until_ready(tcn_forward(x, block_params, fc_w, fc_b, kernel_size))

    ref32 = _ref_forward(x, torch_params, fc_w_t, fc_b_t, kernel_size, cast_bf16=False)
    ref16 = _ref_forward(x, torch_params, fc_w_t, fc_b_t, kernel_size, cast_bf16=True)

    assert out.shape == (B, output_size)
    # Tight check against a bf16-matched reference, loose check against full-f32 PyTorch math.
    assert jnp.allclose(out, ref16, atol=1e-2, rtol=1e-2), (out, ref16)
    assert jnp.allclose(out, ref32, atol=3e-2, rtol=3e-2), (out, ref32)
    assert jnp.allclose(jnp.sum(out, axis=1), 1.0, atol=1e-3)

    print("KERNEL_OK")
</pallas_src>

<mosaic_0001>
module attributes {stable_mosaic.version = 11 : i64} {
  func.func @kernel(%arg0: i32, %arg1: memref<1x16x8xf32, #tpu.memory_space<vmem>>, %arg2: memref<24x16xbf16, #tpu.memory_space<vmem>>, %arg3: memref<1x16xf32, #tpu.memory_space<vmem>>, %arg4: memref<48x16xbf16, #tpu.memory_space<vmem>>, %arg5: memref<1x16xf32, #tpu.memory_space<vmem>>, %arg6: memref<8x16xbf16, #tpu.memory_space<vmem>>, %arg7: memref<1x16xf32, #tpu.memory_space<vmem>>, %arg8: memref<48x16xbf16, #tpu.memory_space<vmem>>, %arg9: memref<1x16xf32, #tpu.memory_space<vmem>>, %arg10: memref<48x16xbf16, #tpu.memory_space<vmem>>, %arg11: memref<1x16xf32, #tpu.memory_space<vmem>>, %arg12: memref<16x4xbf16, #tpu.memory_space<vmem>>, %arg13: memref<1x4xf32, #tpu.memory_space<vmem>>, %arg14: memref<1x1x4xf32, #tpu.memory_space<vmem>>) attributes {dimension_semantics = [#tpu.dimension_semantics<parallel>], iteration_bounds = array<i64: 2>, scalar_prefetch = 0 : i64, scratch_operands = 0 : i64, tpu.core_type = #tpu.core_type<tc>, window_params = [{transform_indices = @transform_0, window_bounds = array<i64: 1, 16, 8>}, {pipeline_mode = #tpu.pipeline_mode<synchronous>, transform_indices = @transform_1, window_bounds = array<i64: 24, 16>}, {pipeline_mode = #tpu.pipeline_mode<synchronous>, transform_indices = @transform_2, window_bounds = array<i64: 1, 16>}, {pipeline_mode = #tpu.pipeline_mode<synchronous>, transform_indices = @transform_3, window_bounds = array<i64: 48, 16>}, {pipeline_mode = #tpu.pipeline_mode<synchronous>, transform_indices = @transform_4, window_bounds = array<i64: 1, 16>}, {pipeline_mode = #tpu.pipeline_mode<synchronous>, transform_indices = @transform_5, window_bounds = array<i64: 8, 16>}, {pipeline_mode = #tpu.pipeline_mode<synchronous>, transform_indices = @transform_6, window_bounds = array<i64: 1, 16>}, {pipeline_mode = #tpu.pipeline_mode<synchronous>, transform_indices = @transform_7, window_bounds = array<i64: 48, 16>}, {pipeline_mode = #tpu.pipeline_mode<synchronous>, transform_indices = @transform_8, window_bounds = array<i64: 1, 16>}, {pipeline_mode = #tpu.pipeline_mode<synchronous>, transform_indices = @transform_9, window_bounds = array<i64: 48, 16>}, {pipeline_mode = #tpu.pipeline_mode<synchronous>, transform_indices = @transform_10, window_bounds = array<i64: 1, 16>}, {pipeline_mode = #tpu.pipeline_mode<synchronous>, transform_indices = @transform_11, window_bounds = array<i64: 16, 4>}, {pipeline_mode = #tpu.pipeline_mode<synchronous>, transform_indices = @transform_12, window_bounds = array<i64: 1, 4>}, {transform_indices = @transform_13, window_bounds = array<i64: 1, 1, 4>}]} {
    %0 = tpu.iota {dimensions = array<i32: 0>} : vector<16x1xi32>
    %c1_i32 = arith.constant 1 : i32
    %1 = vector.broadcast %c1_i32 : i32 to vector<16x1xi32>
    %2 = arith.cmpi sge, %0, %1 : vector<16x1xi32>
    %3 = arith.extui %2 : vector<16x1xi1> to vector<16x1xi32>
    %4 = arith.sitofp %3 : vector<16x1xi32> to vector<16x1xf32>
    %c2_i32 = arith.constant 2 : i32
    %5 = vector.broadcast %c2_i32 : i32 to vector<16x1xi32>
    %6 = arith.cmpi sge, %0, %5 : vector<16x1xi32>
    %7 = arith.extui %6 : vector<16x1xi1> to vector<16x1xi32>
    %8 = arith.sitofp %7 : vector<16x1xi32> to vector<16x1xf32>
    %c4_i32 = arith.constant 4 : i32
    %9 = vector.broadcast %c4_i32 : i32 to vector<16x1xi32>
    %10 = arith.cmpi sge, %0, %9 : vector<16x1xi32>
    %11 = arith.extui %10 : vector<16x1xi1> to vector<16x1xi32>
    %12 = arith.sitofp %11 : vector<16x1xi32> to vector<16x1xf32>
    %c0 = arith.constant 0 : index
    %c0_0 = arith.constant 0 : index
    %c0_1 = arith.constant 0 : index
    %13 = vector.load %arg1[%c0, %c0_0, %c0_1] : memref<1x16x8xf32, #tpu.memory_space<vmem>>, vector<1x16x8xf32>
    %14 = vector.shape_cast %13 : vector<1x16x8xf32> to vector<16x8xf32>
    %15 = arith.truncf %14 : vector<16x8xf32> to vector<16x8xbf16>
    %c0_2 = arith.constant 0 : index
    %c0_3 = arith.constant 0 : index
    %16 = vector.load %arg2[%c0_2, %c0_3] : memref<24x16xbf16, #tpu.memory_space<vmem>>, vector<8x16xbf16>
    %c2_i32_4 = arith.constant 2 : i32
    %17 = tpu.dynamic_rotate %14 by %c2_i32_4 dim 0 : vector<16x8xf32>, i32 -> vector<16x8xf32>
    %18 = vector.broadcast %8 : vector<16x1xf32> to vector<16x8xf32>
    %19 = arith.mulf %17, %18 : vector<16x8xf32>
    %20 = arith.truncf %19 : vector<16x8xf32> to vector<16x8xbf16>
    %cst = arith.constant dense<0.000000e+00> : vector<16x16xf32>
    %21 = tpu.matmul %20, %16, %cst {dimension_numbers = #tpu.dot_dimension_numbers<[1], [0], [0], [1], [0, 0, 1, 1], [], []>} : vector<16x8xbf16>, vector<8x16xbf16>, vector<16x16xf32> -> vector<16x16xf32>
    %c8 = arith.constant 8 : index
    %c0_5 = arith.constant 0 : index
    %22 = vector.load %arg2[%c8, %c0_5] : memref<24x16xbf16, #tpu.memory_space<vmem>>, vector<8x16xbf16>
    %c1_i32_6 = arith.constant 1 : i32
    %23 = tpu.dynamic_rotate %14 by %c1_i32_6 dim 0 : vector<16x8xf32>, i32 -> vector<16x8xf32>
    %24 = vector.broadcast %4 : vector<16x1xf32> to vector<16x8xf32>
    %25 = arith.mulf %23, %24 : vector<16x8xf32>
    %26 = arith.truncf %25 : vector<16x8xf32> to vector<16x8xbf16>
    %cst_7 = arith.constant dense<0.000000e+00> : vector<16x16xf32>
    %27 = tpu.matmul %26, %22, %cst_7 {dimension_numbers = #tpu.dot_dimension_numbers<[1], [0], [0], [1], [0, 0, 1, 1], [], []>} : vector<16x8xbf16>, vector<8x16xbf16>, vector<16x16xf32> -> vector<16x16xf32>
    %28 = arith.addf %21, %27 : vector<16x16xf32>
    %c16 = arith.constant 16 : index
    %c0_8 = arith.constant 0 : index
    %29 = vector.load %arg2[%c16, %c0_8] : memref<24x16xbf16, #tpu.memory_space<vmem>>, vector<8x16xbf16>
    %cst_9 = arith.constant dense<0.000000e+00> : vector<16x16xf32>
    %30 = tpu.matmul %15, %29, %cst_9 {dimension_numbers = #tpu.dot_dimension_numbers<[1], [0], [0], [1], [0, 0, 1, 1], [], []>} : vector<16x8xbf16>, vector<8x16xbf16>, vector<16x16xf32> -> vector<16x16xf32>
    %31 = arith.addf %28, %30 : vector<16x16xf32>
    %c0_10 = arith.constant 0 : index
    %c0_11 = arith.constant 0 : index
    %32 = vector.load %arg3[%c0_10, %c0_11] : memref<1x16xf32, #tpu.memory_space<vmem>>, vector<1x16xf32>
    %33 = vector.broadcast %32 : vector<1x16xf32> to vector<16x16xf32>
    %34 = arith.addf %31, %33 : vector<16x16xf32>
    %cst_12 = arith.constant 0.000000e+00 : f32
    %35 = vector.broadcast %cst_12 : f32 to vector<16x16xf32>
    %36 = arith.maximumf %34, %35 : vector<16x16xf32>
    %37 = arith.truncf %36 : vector<16x16xf32> to vector<16x16xbf16>
    %c0_13 = arith.constant 0 : index
    %c0_14 = arith.constant 0 : index
    %38 = vector.load %arg4[%c0_13, %c0_14] : memref<48x16xbf16, #tpu.memory_space<vmem>>, vector<16x16xbf16>
    %c2_i32_15 = arith.constant 2 : i32
    %39 = tpu.dynamic_rotate %36 by %c2_i32_15 dim 0 : vector<16x16xf32>, i32 -> vector<16x16xf32>
    %40 = vector.broadcast %8 : vector<16x1xf32> to vector<16x16xf32>
    %41 = arith.mulf %39, %40 : vector<16x16xf32>
    %42 = arith.truncf %41 : vector<16x16xf32> to vector<16x16xbf16>
    %cst_16 = arith.constant dense<0.000000e+00> : vector<16x16xf32>
    %43 = tpu.matmul %42, %38, %cst_16 {dimension_numbers = #tpu.dot_dimension_numbers<[1], [0], [0], [1], [0, 0, 1, 1], [], []>} : vector<16x16xbf16>, vector<16x16xbf16>, vector<16x16xf32> -> vector<16x16xf32>
    %c16_17 = arith.constant 16 : index
    %c0_18 = arith.constant 0 : index
    %44 = vector.load %arg4[%c16_17, %c0_18] : memref<48x16xbf16, #tpu.memory_space<vmem>>, vector<16x16xbf16>
    %c1_i32_19 = arith.constant 1 : i32
    %45 = tpu.dynamic_rotate %36 by %c1_i32_19 dim 0 : vector<16x16xf32>, i32 -> vector<16x16xf32>
    %46 = vector.broadcast %4 : vector<16x1xf32> to vector<16x16xf32>
    %47 = arith.mulf %45, %46 : vector<16x16xf32>
    %48 = arith.truncf %47 : vector<16x16xf32> to vector<16x16xbf16>
    %cst_20 = arith.constant dense<0.000000e+00> : vector<16x16xf32>
    %49 = tpu.matmul %48, %44, %cst_20 {dimension_numbers = #tpu.dot_dimension_numbers<[1], [0], [0], [1], [0, 0, 1, 1], [], []>} : vector<16x16xbf16>, vector<16x16xbf16>, vector<16x16xf32> -> vector<16x16xf32>
    %50 = arith.addf %43, %49 : vector<16x16xf32>
    %c32 = arith.constant 32 : index
    %c0_21 = arith.constant 0 : index
    %51 = vector.load %arg4[%c32, %c0_21] : memref<48x16xbf16, #tpu.memory_space<vmem>>, vector<16x16xbf16>
    %cst_22 = arith.constant dense<0.000000e+00> : vector<16x16xf32>
    %52 = tpu.matmul %37, %51, %cst_22 {dimension_numbers = #tpu.dot_dimension_numbers<[1], [0], [0], [1], [0, 0, 1, 1], [], []>} : vector<16x16xbf16>, vector<16x16xbf16>, vector<16x16xf32> -> vector<16x16xf32>
    %53 = arith.addf %50, %52 : vector<16x16xf32>
    %c0_23 = arith.constant 0 : index
    %c0_24 = arith.constant 0 : index
    %54 = vector.load %arg5[%c0_23, %c0_24] : memref<1x16xf32, #tpu.memory_space<vmem>>, vector<1x16xf32>
    %55 = vector.broadcast %54 : vector<1x16xf32> to vector<16x16xf32>
    %56 = arith.addf %53, %55 : vector<16x16xf32>
    %cst_25 = arith.constant 0.000000e+00 : f32
    %57 = vector.broadcast %cst_25 : f32 to vector<16x16xf32>
    %58 = arith.maximumf %56, %57 : vector<16x16xf32>
    %c0_26 = arith.constant 0 : index
    %c0_27 = arith.constant 0 : index
    %59 = vector.load %arg6[%c0_26, %c0_27] : memref<8x16xbf16, #tpu.memory_space<vmem>>, vector<8x16xbf16>
    %cst_28 = arith.constant dense<0.000000e+00> : vector<16x16xf32>
    %60 = tpu.matmul %15, %59, %cst_28 {dimension_numbers = #tpu.dot_dimension_numbers<[1], [0], [0], [1], [0, 0, 1, 1], [], []>} : vector<16x8xbf16>, vector<8x16xbf16>, vector<16x16xf32> -> vector<16x16xf32>
    %c0_29 = arith.constant 0 : index
    %c0_30 = arith.constant 0 : index
    %61 = vector.load %arg7[%c0_29, %c0_30] : memref<1x16xf32, #tpu.memory_space<vmem>>, vector<1x16xf32>
    %62 = vector.broadcast %61 : vector<1x16xf32> to vector<16x16xf32>
    %63 = arith.addf %60, %62 : vector<16x16xf32>
    %64 = arith.addf %58, %63 : vector<16x16xf32>
    %cst_31 = arith.constant 0.000000e+00 : f32
    %65 = vector.broadcast %cst_31 : f32 to vector<16x16xf32>
    %66 = arith.maximumf %64, %65 : vector<16x16xf32>
    %67 = arith.truncf %66 : vector<16x16xf32> to vector<16x16xbf16>
    %c0_32 = arith.constant 0 : index
    %c0_33 = arith.constant 0 : index
    %68 = vector.load %arg8[%c0_32, %c0_33] : memref<48x16xbf16, #tpu.memory_space<vmem>>, vector<16x16xbf16>
    %c4_i32_34 = arith.constant 4 : i32
    %69 = tpu.dynamic_rotate %66 by %c4_i32_34 dim 0 : vector<16x16xf32>, i32 -> vector<16x16xf32>
    %70 = vector.broadcast %12 : vector<16x1xf32> to vector<16x16xf32>
    %71 = arith.mulf %69, %70 : vector<16x16xf32>
    %72 = arith.truncf %71 : vector<16x16xf32> to vector<16x16xbf16>
    %cst_35 = arith.constant dense<0.000000e+00> : vector<16x16xf32>
    %73 = tpu.matmul %72, %68, %cst_35 {dimension_numbers = #tpu.dot_dimension_numbers<[1], [0], [0], [1], [0, 0, 1, 1], [], []>} : vector<16x16xbf16>, vector<16x16xbf16>, vector<16x16xf32> -> vector<16x16xf32>
    %c16_36 = arith.constant 16 : index
    %c0_37 = arith.constant 0 : index
    %74 = vector.load %arg8[%c16_36, %c0_37] : memref<48x16xbf16, #tpu.memory_space<vmem>>, vector<16x16xbf16>
    %c2_i32_38 = arith.constant 2 : i32
    %75 = tpu.dynamic_rotate %66 by %c2_i32_38 dim 0 : vector<16x16xf32>, i32 -> vector<16x16xf32>
    %76 = vector.broadcast %8 : vector<16x1xf32> to vector<16x16xf32>
    %77 = arith.mulf %75, %76 : vector<16x16xf32>
    %78 = arith.truncf %77 : vector<16x16xf32> to vector<16x16xbf16>
    %cst_39 = arith.constant dense<0.000000e+00> : vector<16x16xf32>
    %79 = tpu.matmul %78, %74, %cst_39 {dimension_numbers = #tpu.dot_dimension_numbers<[1], [0], [0], [1], [0, 0, 1, 1], [], []>} : vector<16x16xbf16>, vector<16x16xbf16>, vector<16x16xf32> -> vector<16x16xf32>
    %80 = arith.addf %73, %79 : vector<16x16xf32>
    %c32_40 = arith.constant 32 : index
    %c0_41 = arith.constant 0 : index
    %81 = vector.load %arg8[%c32_40, %c0_41] : memref<48x16xbf16, #tpu.memory_space<vmem>>, vector<16x16xbf16>
    %cst_42 = arith.constant dense<0.000000e+00> : vector<16x16xf32>
    %82 = tpu.matmul %67, %81, %cst_42 {dimension_numbers = #tpu.dot_dimension_numbers<[1], [0], [0], [1], [0, 0, 1, 1], [], []>} : vector<16x16xbf16>, vector<16x16xbf16>, vector<16x16xf32> -> vector<16x16xf32>
    %83 = arith.addf %80, %82 : vector<16x16xf32>
    %c0_43 = arith.constant 0 : index
    %c0_44 = arith.constant 0 : index
    %84 = vector.load %arg9[%c0_43, %c0_44] : memref<1x16xf32, #tpu.memory_space<vmem>>, vector<1x16xf32>
    %85 = vector.broadcast %84 : vector<1x16xf32> to vector<16x16xf32>
    %86 = arith.addf %83, %85 : vector<16x16xf32>
    %cst_45 = arith.constant 0.000000e+00 : f32
    %87 = vector.broadcast %cst_45 : f32 to vector<16x16xf32>
    %88 = arith.maximumf %86, %87 : vector<16x16xf32>
    %89 = arith.truncf %88 : vector<16x16xf32> to vector<16x16xbf16>
    %c0_46 = arith.constant 0 : index
    %c0_47 = arith.constant 0 : index
    %90 = vector.load %arg10[%c0_46, %c0_47] : memref<48x16xbf16, #tpu.memory_space<vmem>>, vector<16x16xbf16>
    %c4_i32_48 = arith.constant 4 : i32
    %91 = tpu.dynamic_rotate %88 by %c4_i32_48 dim 0 : vector<16x16xf32>, i32 -> vector<16x16xf32>
    %92 = vector.broadcast %12 : vector<16x1xf32> to vector<16x16xf32>
    %93 = arith.mulf %91, %92 : vector<16x16xf32>
    %94 = arith.truncf %93 : vector<16x16xf32> to vector<16x16xbf16>
    %cst_49 = arith.constant dense<0.000000e+00> : vector<16x16xf32>
    %95 = tpu.matmul %94, %90, %cst_49 {dimension_numbers = #tpu.dot_dimension_numbers<[1], [0], [0], [1], [0, 0, 1, 1], [], []>} : vector<16x16xbf16>, vector<16x16xbf16>, vector<16x16xf32> -> vector<16x16xf32>
    %c16_50 = arith.constant 16 : index
    %c0_51 = arith.constant 0 : index
    %96 = vector.load %arg10[%c16_50, %c0_51] : memref<48x16xbf16, #tpu.memory_space<vmem>>, vector<16x16xbf16>
    %c2_i32_52 = arith.constant 2 : i32
    %97 = tpu.dynamic_rotate %88 by %c2_i32_52 dim 0 : vector<16x16xf32>, i32 -> vector<16x16xf32>
    %98 = vector.broadcast %8 : vector<16x1xf32> to vector<16x16xf32>
    %99 = arith.mulf %97, %98 : vector<16x16xf32>
    %100 = arith.truncf %99 : vector<16x16xf32> to vector<16x16xbf16>
    %cst_53 = arith.constant dense<0.000000e+00> : vector<16x16xf32>
    %101 = tpu.matmul %100, %96, %cst_53 {dimension_numbers = #tpu.dot_dimension_numbers<[1], [0], [0], [1], [0, 0, 1, 1], [], []>} : vector<16x16xbf16>, vector<16x16xbf16>, vector<16x16xf32> -> vector<16x16xf32>
    %102 = arith.addf %95, %101 : vector<16x16xf32>
    %c32_54 = arith.constant 32 : index
    %c0_55 = arith.constant 0 : index
    %103 = vector.load %arg10[%c32_54, %c0_55] : memref<48x16xbf16, #tpu.memory_space<vmem>>, vector<16x16xbf16>
    %cst_56 = arith.constant dense<0.000000e+00> : vector<16x16xf32>
    %104 = tpu.matmul %89, %103, %cst_56 {dimension_numbers = #tpu.dot_dimension_numbers<[1], [0], [0], [1], [0, 0, 1, 1], [], []>} : vector<16x16xbf16>, vector<16x16xbf16>, vector<16x16xf32> -> vector<16x16xf32>
    %105 = arith.addf %102, %104 : vector<16x16xf32>
    %c0_57 = arith.constant 0 : index
    %c0_58 = arith.constant 0 : index
    %106 = vector.load %arg11[%c0_57, %c0_58] : memref<1x16xf32, #tpu.memory_space<vmem>>, vector<1x16xf32>
    %107 = vector.broadcast %106 : vector<1x16xf32> to vector<16x16xf32>
    %108 = arith.addf %105, %107 : vector<16x16xf32>
    %cst_59 = arith.constant 0.000000e+00 : f32
    %109 = vector.broadcast %cst_59 : f32 to vector<16x16xf32>
    %110 = arith.maximumf %108, %109 : vector<16x16xf32>
    %111 = arith.addf %110, %66 : vector<16x16xf32>
    %cst_60 = arith.constant 0.000000e+00 : f32
    %112 = vector.broadcast %cst_60 : f32 to vector<16x16xf32>
    %113 = arith.maximumf %111, %112 : vector<16x16xf32>
    %114 = vector.extract_strided_slice %113 {offsets = [15, 0], sizes = [1, 16], strides = [1, 1]} : vector<16x16xf32> to vector<1x16xf32>
    %115 = arith.truncf %114 : vector<1x16xf32> to vector<1x16xbf16>
    %c0_61 = arith.constant 0 : index
    %c0_62 = arith.constant 0 : index
    %116 = vector.load %arg12[%c0_61, %c0_62] : memref<16x4xbf16, #tpu.memory_space<vmem>>, vector<16x4xbf16>
    %cst_63 = arith.constant dense<0.000000e+00> : vector<1x4xf32>
    %117 = tpu.matmul %115, %116, %cst_63 {dimension_numbers = #tpu.dot_dimension_numbers<[1], [0], [0], [1], [0, 0, 1, 1], [], []>} : vector<1x16xbf16>, vector<16x4xbf16>, vector<1x4xf32> -> vector<1x4xf32>
    %c0_64 = arith.constant 0 : index
    %c0_65 = arith.constant 0 : index
    %118 = vector.load %arg13[%c0_64, %c0_65] : memref<1x4xf32, #tpu.memory_space<vmem>>, vector<1x4xf32>
    %119 = arith.addf %117, %118 : vector<1x4xf32>
    %cst_66 = arith.constant dense<0xFF800000> : vector<1xf32>
    %120 = vector.multi_reduction <maximumf>, %119, %cst_66 [1] : vector<1x4xf32> to vector<1xf32>
    %121 = vector.shape_cast %120 : vector<1xf32> to vector<1x1xf32>
    %122 = vector.broadcast %121 : vector<1x1xf32> to vector<1x4xf32>
    %123 = arith.subf %119, %122 : vector<1x4xf32>
    %124 = math.exp %123 : vector<1x4xf32>
    %cst_67 = arith.constant dense<0.000000e+00> : vector<1xf32>
    %125 = vector.multi_reduction <add>, %124, %cst_67 [1] : vector<1x4xf32> to vector<1xf32>
    %126 = vector.shape_cast %125 : vector<1xf32> to vector<1x1xf32>
    %127 = vector.broadcast %126 : vector<1x1xf32> to vector<1x4xf32>
    %128 = arith.divf %124, %127 : vector<1x4xf32>
    %c0_68 = arith.constant 0 : index
    %c0_69 = arith.constant 0 : index
    %c0_70 = arith.constant 0 : index
    %129 = vector.load %arg14[%c0_68, %c0_69, %c0_70] : memref<1x1x4xf32, #tpu.memory_space<vmem>>, vector<1x1x4xf32>
    %130 = vector.shape_cast %129 : vector<1x1x4xf32> to vector<1x4xf32>
    %131 = vector.shape_cast %128 : vector<1x4xf32> to vector<1x1x4xf32>
    tpu.vector_store %arg14[%c0_68, %c0_69, %c0_70], %131 {strides = array<i32>} : memref<1x1x4xf32, #tpu.memory_space<vmem>>, vector<1x1x4xf32>,
    return
  }
  func.func @transform_0(%arg0: i32) -> (i32, i32, i32) {
    %c0_i32 = arith.constant 0 : i32
    %c0_i32_0 = arith.constant 0 : i32
    %c0_i32_1 = arith.constant 0 : i32
    return %arg0, %c0_i32, %c0_i32_0 : i32, i32, i32
  }
  func.func @transform_1(%arg0: i32) -> (i32, i32) {
    %c0_i32 = arith.constant 0 : i32
    %c0_i32_0 = arith.constant 0 : i32
    %c0_i32_1 = arith.constant 0 : i32
    return %c0_i32, %c0_i32_0 : i32, i32
  }
  func.func @transform_2(%arg0: i32) -> (i32, i32) {
    %c0_i32 = arith.constant 0 : i32
    %c0_i32_0 = arith.constant 0 : i32
    %c0_i32_1 = arith.constant 0 : i32
    return %c0_i32, %c0_i32_0 : i32, i32
  }
  func.func @transform_3(%arg0: i32) -> (i32, i32) {
    %c0_i32 = arith.constant 0 : i32
    %c0_i32_0 = arith.constant 0 : i32
    %c0_i32_1 = arith.constant 0 : i32
    return %c0_i32, %c0_i32_0 : i32, i32
  }
  func.func @transform_4(%arg0: i32) -> (i32, i32) {
    %c0_i32 = arith.constant 0 : i32
    %c0_i32_0 = arith.constant 0 : i32
    %c0_i32_1 = arith.constant 0 : i32
    return %c0_i32, %c0_i32_0 : i32, i32
  }
  func.func @transform_5(%arg0: i32) -> (i32, i32) {
    %c0_i32 = arith.constant 0 : i32
    %c0_i32_0 = arith.constant 0 : i32
    %c0_i32_1 = arith.constant 0 : i32
    return %c0_i32, %c0_i32_0 : i32, i32
  }
  func.func @transform_6(%arg0: i32) -> (i32, i32) {
    %c0_i32 = arith.constant 0 : i32
    %c0_i32_0 = arith.constant 0 : i32
    %c0_i32_1 = arith.constant 0 : i32
    return %c0_i32, %c0_i32_0 : i32, i32
  }
  func.func @transform_7(%arg0: i32) -> (i32, i32) {
    %c0_i32 = arith.constant 0 : i32
    %c0_i32_0 = arith.constant 0 : i32
    %c0_i32_1 = arith.constant 0 : i32
    return %c0_i32, %c0_i32_0 : i32, i32
  }
  func.func @transform_8(%arg0: i32) -> (i32, i32) {
    %c0_i32 = arith.constant 0 : i32
    %c0_i32_0 = arith.constant 0 : i32
    %c0_i32_1 = arith.constant 0 : i32
    return %c0_i32, %c0_i32_0 : i32, i32
  }
  func.func @transform_9(%arg0: i32) -> (i32, i32) {
    %c0_i32 = arith.constant 0 : i32
    %c0_i32_0 = arith.constant 0 : i32
    %c0_i32_1 = arith.constant 0 : i32
    return %c0_i32, %c0_i32_0 : i32, i32
  }
  func.func @transform_10(%arg0: i32) -> (i32, i32) {
    %c0_i32 = arith.constant 0 : i32
    %c0_i32_0 = arith.constant 0 : i32
    %c0_i32_1 = arith.constant 0 : i32
    return %c0_i32, %c0_i32_0 : i32, i32
  }
  func.func @transform_11(%arg0: i32) -> (i32, i32) {
    %c0_i32 = arith.constant 0 : i32
    %c0_i32_0 = arith.constant 0 : i32
    %c0_i32_1 = arith.constant 0 : i32
    return %c0_i32, %c0_i32_0 : i32, i32
  }
  func.func @transform_12(%arg0: i32) -> (i32, i32) {
    %c0_i32 = arith.constant 0 : i32
    %c0_i32_0 = arith.constant 0 : i32
    %c0_i32_1 = arith.constant 0 : i32
    return %c0_i32, %c0_i32_0 : i32, i32
  }
  func.func @transform_13(%arg0: i32) -> (i32, i32, i32) {
    %c0_i32 = arith.constant 0 : i32
    %c0_i32_0 = arith.constant 0 : i32
    %c0_i32_1 = arith.constant 0 : i32
    return %arg0, %c0_i32, %c0_i32_0 : i32, i32, i32
  }
}

</mosaic_0001>

<bundles_post_ra>
// kernel: tpu_custom_call.1
= control target key start
LH: loop header
LB: loop body
LE: loop exit
PB: predicated region body
PF: predicated region fallthrough
CT: control target
= control target key end

     0   :  { %s1995_s0 = inlined_call_operand.vmem [shape: f32[2,16,8], index: 0, kind: input, shape index: {}]   ;;  %s1996_s1 = inlined_call_operand.vmem [shape: bf16[24,16], index: 1, kind: input, shape index: {}]   ;;  %s1997_s2 = inlined_call_operand.vmem [shape: f32[1,16], index: 2, kind: input, shape index: {}]   ;;  %s1998_s3 = inlined_call_operand.vmem [shape: bf16[48,16], index: 3, kind: input, shape index: {}]   ;;  %s1999_s4 = inlined_call_operand.vmem [shape: f32[1,16], index: 4, kind: input, shape index: {}]   ;;  %s2000_s5 = inlined_call_operand.vmem [shape: bf16[8,16], index: 5, kind: input, shape index: {}]   ;;  %s2001_s6 = inlined_call_operand.vmem [shape: f32[1,16], index: 6, kind: input, shape index: {}]   ;;  %s2002_s7 = inlined_call_operand.vmem [shape: bf16[48,16], index: 7, kind: input, shape index: {}]   ;;  %s2003_s8 = inlined_call_operand.vmem [shape: f32[1,16], index: 8, kind: input, shape index: {}]   ;;  %s2004_s9 = inlined_call_operand.vmem [shape: bf16[48,16], index: 9, kind: input, shape index: {}]   ;;  %s2005_s10 = inlined_call_operand.vmem [shape: f32[1,16], index: 10, kind: input, shape index: {}]   ;;  %s2006_s11 = inlined_call_operand.vmem [shape: bf16[16,4], index: 11, kind: input, shape index: {}]   ;;  %s2007_s12 = inlined_call_operand.vmem [shape: f32[1,4], index: 12, kind: input, shape index: {}]   ;;  %s2008_s13 = inlined_call_operand.hbm [shape: f32[2,1,4], index: 13, kind: output, shape index: {}]  }
   0x1   :  { %2009 = sst [smem:[#allocation5_spill]] %s1995_s0 }
   0x2   :  { %2010 = sst [smem:[#allocation6_spill]] %s1996_s1 }
   0x3   :  { %2011 = sst [smem:[#allocation7_spill]] %s1997_s2 }
   0x4   :  { %2012 = sst [smem:[#allocation8_spill]] %s1998_s3 }
   0x5   :  { %18 = vsyncpa [#allocation3], 0 }
   0x6   :  { %20 = vsyncpa [#allocation3 + $0x1], 0  ;;  %s1726_s25 = smov 0   ;;  %s1728_s26 = smov 0  }
   0x7   :  { %s1730_s27 = smov 0   ;;  %s1732_s28 = smov 0  }
   0x8 LB: > { %s1747_s29 = sadd.s32 4294967295, %s1651_s28   ;;  %s1382_s30 = sadd.s32 4294967294, %s1651_s28   ;;  %s1651_s28 = sphi %s1732_s28, %s2022_s28   ;;  %s1647_s27 = sphi %s1730_s27, %s2021_s27   ;;  %s1643_s26 = sphi %s1728_s26, %s2020_s26   ;;  %s1639_s25 = sphi %s1726_s25, %s2019_s25  }
   0x9   : > { %s1751_s14 = sadd.s32 1, %s1651_s28   ;;  %s311_s15 = sadd.s32 1, %s1647_s27 }
   0xa   : > { %s308_s16 = ssub.s32 %s1651_s28, %s1751_s14  ;;  %p321_p0 = scmp.ne.s32.totalorder %s1647_s27, %s1643_s26 }
   0xb   : > { %p309_p1 = scmp.eq.s32.totalorder %s308_s16, 0  ;;  %p322_p2 = scmp.eq.s32.totalorder %s1747_s29, 1 }
   0xc   : > { %p327_p3 = scmp.ne.s32.totalorder %s1643_s26, %s1639_s25  ;;  %p328_p4 = scmp.eq.s32.totalorder %s1382_s30, 1 }
   0xd   : > { %s1762_s17 = scalar_select %p309_p1, %s1647_s27, %s311_s15  }
   0xe   : > { %p1764_p5 = por %p322_p2, %p321_p0  ;;  %p1768_p6 = por %p328_p4, %p327_p3 }
   0xf   : > { %p1385_p7 = scmp.ge.s32.totalorder %s1651_s28, 1  ;;  %p390_p8 = scmp.lt.s32.totalorder %s1651_s28, 3 }
  0x11   : > { %p391_p9 = pnand %p1385_p7, %p390_p8 }
  0x12   : > { %s2015_s1 = sld [smem:[#allocation6_spill]] (!%p391_p9)  ;;  %p433_p10 = scmp.lt.s32.totalorder (!%p391_p9), %s1747_s29, 1 }
  0x13   : > { %394 = sbr.rel (%p391_p9) target bundleno = 1436 (0x59c), region = 72  ;;  %s2016_s0 = sld [smem:[#allocation5_spill]] (!%p391_p9) }
  0x14   : > { %s2017_s3 = sld [smem:[#allocation8_spill]] (!%p391_p9)  ;;  %s1420_s15 = sshll.u32 (!%p391_p9), %s1747_s29, 4 }
  0x15   : > { %s2018_s2 = sld [smem:[#allocation7_spill]] (!%p391_p9)  ;;  %s1325_s23 = scalar_lea.hbm (!%p391_p9), %s2008_s13, %s1420_s15 }
  0x18   : > { %v472_v0 = vld [vmem:[%s2015_s1 + $0x4] sm:$0xf]  ;;  %vm485_vm0 = vcmask 1043456   ;;  %v463_v1 = vld [vmem:[%s2015_s1] sm:$0xf]  ;;  %v439_v2 = vlaneseq  ;;  %v1653_v3 = vmov 0.0  }
  0x19   : > { %1452 = vmatprep.subr.bf16.mxu0 %v1653_v3  ;;  %v487_v4 = vsel %vm485_vm0, %v472_v0, 0  ;;  %1458 = vmatprep.subr.bf16.mxu1 %v1653_v3  ;;  %v534_v5 = vsel %vm485_vm0, %v463_v1, 0  ;;  %vm1654_vm1 = vmmov 0   ;;  %s434_s24 = scalar_select %p433_p10, %s1747_s29, 1  ;;  %v577_v15 = vld [vmem:[%s2015_s1 + $0x8] sm:$0xf] }
  0x1a   : > { %1453 = vmatpush3.bf16.msra.mxu0 %v487_v4  ;;  %1459 = vmatpush3.bf16.msra.mxu1 %v534_v5  ;;  %v1785_v6 = vshrl.u32 %v439_v2, 7  ;;  %vm481_vm6 = vcmask 64512   ;;  %v582_v24 = vsel %vm485_vm0, %v577_v15, 0  ;;  %v1577_v26 = vld [vmem:[%s2017_s3 + $0x8] sm:$0xff]   ;;  %v1578_v27 = vld [vmem:[%s2017_s3] sm:$0xff]   ;;  %vm663_vm7 = vcmask 130048  }
  0x1b   : > { %1454 = vmatprep.mubr.msk.bf16.mxu0 %vm1654_vm1, %v1653_v3  ;;  %1460 = vmatprep.mubr.msk.bf16.mxu1 %vm1654_vm1, %v1653_v3  ;;  %s1423_s30 = sshll.u32 %s434_s24, 4  ;;  %v1394_v38 = vld [vmem:[%s2018_s2] ss:$0 sm:$0xff]  ;;  %v1579_v60 = vld [vmem:[%s2017_s3 + $0x10] sm:$0xff]   ;;  %v1580_v1 = vld [vmem:[%s2002_s7 + $0x8] sm:$0xff]   ;;  %vm1301_vm10 = vcmask 24576  }
  0x1c   : > { %1464 = vmatprep.subr.bf16.mxu0 %v1653_v3  ;;  %vm442_vm2 = vcmp.ge.s32.totalorder %v1785_v6, 1  ;;  %vm448_vm3 = vcmp.ge.s32.totalorder %v1785_v6, 2  ;;  %1470 = vmatprep.subr.bf16.mxu1 %v1653_v3  ;;  %vm475_vm4 = vcmp.lt.s32.totalorder %v1785_v6, 1  ;;  %vm466_vm5 = vcmp.lt.s32.totalorder %v1785_v6, 2  ;;  %s437_s20 = scalar_lea.vmem %s2016_s0, %s1423_s30  ;;  %v823_v55 = vld [vmem:[%s2000_s5] sm:$0xf] }
  0x1d   : > { %v1802_v7 = vsel %vm442_vm2, 1.0, %v1653_v3  ;;  %v460_v8 = vld [vmem:[%s437_s20] sm:$0xff]  ;;  %v461_v9 = vld [vmem:[%s437_s20 + $0x8] sm:$0xff]  ;;  %v1805_v10 = vsel %vm448_vm3, 1.0, %v1653_v3  ;;  %v832_v63 = vsel %vm485_vm0, %v823_v55, 0  ;;  %vm454_vm8 = vcmp.ge.s32.totalorder %v1785_v6, 4 }
  0x1e   : > { %v473_v11 = vrot.slane %v460_v8, 7  ;;  %v474_v12 = vrot.slane %v461_v9, 7  ;;  %v464_v13 = vrot.slane %v460_v8, 6  ;;  %v465_v14 = vrot.slane %v461_v9, 6  ;;  %v1581_v2 = vld [vmem:[%s2002_s7] sm:$0xff]   ;;  %s431_s30 = sand.u32 1, %s1643_s26  }
  0x1f   : > { %v462_v25 = vpack.c.bf16 %v461_v9, %v460_v8  ;;  %vm884_vm9 = vcmp.lt.s32.totalorder %v1785_v6, 4  ;;  %v1586_v6 = vld [vmem:[%s2006_s11] sm:$0xff]   ;;  %s432_s16 = scalar_lea.vmem [#allocation2], %s431_s30  ;;  %s1315_s24 = scalar_lea.sflag [#allocation3], %s431_s30 }
  0x20   : > { %v476_v16 = vsel %vm475_vm4, %v473_v11, %v474_v12  ;;  %v477_v17 = vsel %vm475_vm4, %v474_v12, %v473_v11  ;;  %v467_v18 = vsel %vm466_vm5, %v464_v13, %v465_v14  ;;  %v468_v19 = vsel %vm466_vm5, %v465_v14, %v464_v13  ;;  %s1327_s20 = sshll.u32 %s432_s16, 4  ;;  %s1655_s1 = smov [#allocation2]   ;;  %s1328_s20 = int_to_ptr.vmem [resolvable:$true] %s1327_s20 }
  0x21   : > { %v478_v20 = vmul.f32 %v1802_v7, %v477_v17  ;;  %v469_v21 = vmul.f32 %v1805_v10, %v468_v19  ;;  %v1402_v17 = vld [vmem:[%s2001_s6] ss:$0 sm:$0xff]  ;;  %s1591_s0 = scalar_lea.vmem %s1328_s20, 16  ;;  %s1595_s2 = sshll.u32 %s1655_s1, 4  ;;  %s1596_s2 = int_to_ptr.vmem [resolvable:$false] %s1595_s2 }
  0x22   : > { %p1592_p11 = scmp.ne.s32.totalorder %s1328_s20, %s1591_s0  ;;  %s1597_s29 = scalar_lea.vmem %s1596_s2, 32 }
  0x23   : > { %v480_v22 = vpack.c.bf16 %v476_v16, %v478_v20  ;;  %v471_v23 = vpack.c.bf16 %v467_v18, %v469_v21  ;;  %v1401_v16 = vld [vmem:[%s1999_s4] ss:$0 sm:$0xff]  ;;  %p1598_p0 = scmp.lt.s32.totalorder %s1328_s20, %s1596_s2  ;;  %p1599_p1 = scmp.lt.s32.totalorder %s1597_s29, %s1591_s0 }
  0x24   : > { %p1593_p12 = pnand %p1592_p11, %p1764_p5 }
  0x25   : > { %1455 = vmatmul.mubr.msk.bf16.vlgmr.msra.gmra.mxu0 %vm481_vm6, %v480_v22  ;;  %1461 = vmatmul.mubr.msk.bf16.vlgmr.msra.gmra.mxu1 %vm481_vm6, %v471_v23  ;;  %p1600_p2 = por %p1599_p1, %p1598_p0 }
  0x26   : > { %1465 = vmatpush3.bf16.msra.mxu0 %v582_v24  ;;  %1466 = vmatprep.mubr.msk.bf16.mxu0 %vm1654_vm1, %v1653_v3  ;;  %p1594_p13 = pneg %p1593_p12 }
  0x27   : > { %1476 = vmatprep.subr.bf16.mxu0 %v1653_v3  ;;  %1472 = vmatprep.mubr.msk.bf16.mxu1 %vm1654_vm1, %v1653_v3 }
  0x28   : > { %1471 = vmatpush3.bf16.msra.mxu1 %v1577_v26  ;;  %p1601_p3 = pnand %p1600_p2, %p1594_p13 }
  0x29   : > { %1482 = vmatprep.subr.bf16.mxu1 %v1653_v3 }
  0x2d   : > { %1467 = vmatmul.mubr.msk.bf16.vlgmr.msra.gmra.mxu0 %vm481_vm6, %v462_v25 }
  0x2e   : > { %1478 = vmatprep.mubr.msk.bf16.mxu0 %vm1654_vm1, %v1653_v3  ;;  %1477 = vmatpush3.bf16.msra.mxu0 %v1578_v27 }
  0x2f   : > { %1488 = vmatprep.subr.bf16.mxu0 %v1653_v3 }
  0xe5   : > { %v523_v28 = vpop.f32.mrf.mxu0  ;;  %v570_v29 = vpop.f32.mrf.mxu1 }
  0xe6   : > { %v571_v36 = vadd.f32 %v570_v29, %v523_v28 }
  0xe7   : > { %v1456_v30 = vpop.f32.mrf.mxu0  ;;  %v1462_v31 = vpop.f32.mrf.mxu1 }
  0xe9   : > { %v526_v32 = vpop.f32.mrf.mxu0  ;;  %v573_v33 = vpop.f32.mrf.mxu1 }
  0xea   : > { %v574_v41 = vadd.f32 %v573_v33, %v526_v32 }
  0xeb   : > { %v1457_v34 = vpop.f32.mrf.mxu0  ;;  %v1463_v35 = vpop.f32.mrf.mxu1 }
  0xed   : > { %v618_v37 = vpop.f32.mrf.mxu0 }
  0xee   : > { %v625_v39 = vadd.f32 %v618_v37, %v571_v36 }
  0xef   : > { %v1468_v40 = vpop.f32.mrf.mxu0 }
  0xf0   : > { %v634_v42 = vadd.f32 %v1394_v38, %v625_v39 }
  0xf1   : > { %v621_v43 = vpop.f32.mrf.mxu0 }
  0xf2   : > { %v626_v44 = vadd.f32 %v621_v43, %v574_v41  ;;  %v636_v46 = vmax.f32 %v634_v42, 0.0 }
  0xf3   : > { %v1469_v45 = vpop.f32.mrf.mxu0 }
  0xf4   : > { %v635_v47 = vadd.f32 %v1394_v38, %v626_v44  ;;  %v641_v49 = vrot.slane %v636_v46, 6  ;;  %v650_v50 = vrot.slane %v636_v46, 7  ;;  %v1390_v38 = vsel %vm454_vm8, 1.0, %v1653_v3 }
  0xf6   : > { %v637_v48 = vmax.f32 %v635_v47, 0.0 }
  0xf8   : > { %v642_v51 = vrot.slane %v637_v48, 6  ;;  %v651_v52 = vrot.slane %v637_v48, 7  ;;  %v638_v0 = vpack.c.bf16 %v637_v48, %v636_v46 }
  0xfa   : > { %v644_v53 = vsel %vm466_vm5, %v642_v51, %v641_v49  ;;  %v653_v54 = vsel %vm475_vm4, %v651_v52, %v650_v50  ;;  %v643_v58 = vsel %vm466_vm5, %v641_v49, %v642_v51  ;;  %v652_v59 = vsel %vm475_vm4, %v650_v50, %v651_v52  ;;  %v1582_v49 = vld [vmem:[%s2002_s7 + $0x10] sm:$0xff]  }
  0xfb   : > { %v645_v56 = vmul.f32 %v1805_v10, %v644_v53  ;;  %v654_v57 = vmul.f32 %v1802_v7, %v653_v54  ;;  %v1583_v53 = vld [vmem:[%s2004_s9 + $0x8] sm:$0xff]   ;;  %v1584_v54 = vld [vmem:[%s2004_s9] sm:$0xff]  }
  0xfd   : > { %v656_v61 = vpack.c.bf16 %v652_v59, %v654_v57  ;;  %v647_v62 = vpack.c.bf16 %v643_v58, %v645_v56 }
  0xff   : > { %1473 = vmatmul.mubr.msk.bf16.vlgmr.msra.gmra.mxu1 %vm663_vm7, %v656_v61  ;;  %1479 = vmatmul.mubr.msk.bf16.vlgmr.msra.gmra.mxu0 %vm663_vm7, %v647_v62 }
 0x100   : > { %1483 = vmatpush3.bf16.msra.mxu1 %v1579_v60  ;;  %1489 = vmatpush3.bf16.msra.mxu0 %v832_v63 }
 0x101   : > { %1484 = vmatprep.mubr.msk.bf16.mxu1 %vm1654_vm1, %v1653_v3  ;;  %1490 = vmatprep.mubr.msk.bf16.mxu0 %vm1654_vm1, %v1653_v3 }
 0x102   : > { %1494 = vmatprep.subr.bf16.mxu1 %v1653_v3  ;;  %1500 = vmatprep.subr.bf16.mxu0 %v1653_v3 }
 0x107   : > { %1485 = vmatmul.mubr.msk.bf16.vlgmr.msra.gmra.mxu1 %vm663_vm7, %v638_v0  ;;  %1491 = vmatmul.mubr.msk.bf16.vlgmr.msra.gmra.mxu0 %vm481_vm6, %v462_v25 }
 0x108   : > { %1496 = vmatprep.mubr.msk.bf16.mxu1 %vm1654_vm1, %v1653_v3  ;;  %1502 = vmatprep.mubr.msk.bf16.mxu0 %vm1654_vm1, %v1653_v3 }
 0x109   : > { %1495 = vmatpush3.bf16.msra.mxu1 %v1580_v1  ;;  %1501 = vmatpush3.bf16.msra.mxu0 %v1581_v2  ;;  %v1410_v1 = vld [vmem:[%s2003_s8] ss:$0 sm:$0xff] }
 0x10a   : > { %1506 = vmatprep.subr.bf16.mxu1 %v1653_v3  ;;  %1512 = vmatprep.subr.bf16.mxu0 %v1653_v3 }
 0x1bf   : > { %v701_v4 = vpop.f32.mrf.mxu1  ;;  %v751_v5 = vpop.f32.mrf.mxu0 }
 0x1c0   : > { %v752_v14 = vadd.f32 %v751_v5, %v701_v4 }
 0x1c1   : > { %v1474_v7 = vpop.f32.mrf.mxu1  ;;  %v1480_v8 = vpop.f32.mrf.mxu0 }
 0x1c3   : > { %v704_v9 = vpop.f32.mrf.mxu1  ;;  %v754_v11 = vpop.f32.mrf.mxu0 }
 0x1c4   : > { %v755_v22 = vadd.f32 %v754_v11, %v704_v9 }
 0x1c5   : > { %v1475_v12 = vpop.f32.mrf.mxu1  ;;  %v1481_v13 = vpop.f32.mrf.mxu0 }
 0x1c7   : > { %v803_v15 = vpop.f32.mrf.mxu1  ;;  %v868_v18 = vpop.f32.mrf.mxu0 }
 0x1c8   : > { %v810_v19 = vadd.f32 %v803_v15, %v752_v14  ;;  %v869_v24 = vadd.f32 %v1402_v17, %v868_v18 }
 0x1c9   : > { %v1486_v20 = vpop.f32.mrf.mxu1  ;;  %v1492_v21 = vpop.f32.mrf.mxu0 }
 0x1ca   : > { %v819_v23 = vadd.f32 %v1401_v16, %v810_v19 }
 0x1cb   : > { %v806_v25 = vpop.f32.mrf.mxu1  ;;  %v871_v26 = vpop.f32.mrf.mxu0 }
 0x1cc   : > { %v821_v27 = vmax.f32 %v819_v23, 0.0  ;;  %v811_v28 = vadd.f32 %v806_v25, %v755_v22  ;;  %v872_v34 = vadd.f32 %v1402_v17, %v871_v26  ;;  %v1585_v25 = vld [vmem:[%s2004_s9 + $0x10] sm:$0xff]  }
 0x1cd   : > { %v1487_v29 = vpop.f32.mrf.mxu1  ;;  %v1493_v30 = vpop.f32.mrf.mxu0 }
 0x1ce   : > { %v875_v31 = vadd.f32 %v869_v24, %v821_v27  ;;  %v820_v32 = vadd.f32 %v1401_v16, %v811_v28 }
 0x1d0   : > { %v822_v33 = vmax.f32 %v820_v32, 0.0  ;;  %v877_v35 = vmax.f32 %v875_v31, 0.0 }
 0x1d2   : > { %v876_v36 = vadd.f32 %v872_v34, %v822_v33  ;;  %v882_v39 = vrot.slane %v877_v35, 4  ;;  %v892_v40 = vrot.slane %v877_v35, 6 }
 0x1d4   : > { %v1888_v37 = vmax.f32 %v876_v36, 0.0 }
 0x1d6   : > { %v883_v41 = vrot.slane %v1888_v37, 4  ;;  %v893_v42 = vrot.slane %v1888_v37, 6  ;;  %v879_v52 = vpack.c.bf16 %v1888_v37, %v877_v35 }
 0x1d8   : > { %v895_v43 = vsel %vm466_vm5, %v893_v42, %v892_v40  ;;  %v886_v44 = vsel %vm884_vm9, %v883_v41, %v882_v39  ;;  %v894_v47 = vsel %vm466_vm5, %v892_v40, %v893_v42  ;;  %v885_v48 = vsel %vm884_vm9, %v882_v39, %v883_v41  ;;  %v1417_v40 = vld [vmem:[%s2005_s10] ss:$0 sm:$0xff] }
 0x1d9   : > { %v896_v45 = vmul.f32 %v1805_v10, %v895_v43  ;;  %v887_v46 = vmul.f32 %v1390_v38, %v886_v44 }
 0x1db   : > { %v898_v50 = vpack.c.bf16 %v894_v47, %v896_v45  ;;  %v889_v51 = vpack.c.bf16 %v885_v48, %v887_v46 }
 0x1dd   : > { %1497 = vmatmul.mubr.msk.bf16.vlgmr.msra.gmra.mxu1 %vm663_vm7, %v898_v50  ;;  %1503 = vmatmul.mubr.msk.bf16.vlgmr.msra.gmra.mxu0 %vm663_vm7, %v889_v51  ;;  %v1247_v50 = vld [vmem:[%s2007_s12] sm:$0x1] }
 0x1de   : > { %1507 = vmatpush3.bf16.msra.mxu1 %v1582_v49  ;;  %1508 = vmatprep.mubr.msk.bf16.mxu1 %vm1654_vm1, %v1653_v3 }
 0x1df   : > { %1518 = vmatprep.subr.bf16.mxu1 %v1653_v3  ;;  %1514 = vmatprep.mubr.msk.bf16.mxu0 %vm1654_vm1, %v1653_v3 }
 0x1e0   : > { %1513 = vmatpush3.bf16.msra.mxu0 %v1583_v53 }
 0x1e1   : > { %1524 = vmatprep.subr.bf16.mxu0 %v1653_v3 }
 0x1e5   : > { %1509 = vmatmul.mubr.msk.bf16.vlgmr.msra.gmra.mxu1 %vm663_vm7, %v879_v52 }
 0x1e6   : > { %1520 = vmatprep.mubr.msk.bf16.mxu1 %vm1654_vm1, %v1653_v3  ;;  %1519 = vmatpush3.bf16.msra.mxu1 %v1584_v54 }
 0x1e7   : > { %1530 = vmatprep.subr.bf16.mxu1 %v1653_v3 }
 0x29d   : > { %v942_v55 = vpop.f32.mrf.mxu1  ;;  %v992_v56 = vpop.f32.mrf.mxu0 }
 0x29e   : > { %v993_v63 = vadd.f32 %v992_v56, %v942_v55 }
 0x29f   : > { %v1498_v57 = vpop.f32.mrf.mxu1  ;;  %v1504_v58 = vpop.f32.mrf.mxu0 }
 0x2a1   : > { %v945_v59 = vpop.f32.mrf.mxu1  ;;  %v995_v60 = vpop.f32.mrf.mxu0 }
 0x2a2   : > { %v996_v5 = vadd.f32 %v995_v60, %v945_v59 }
 0x2a3   : > { %v1499_v61 = vpop.f32.mrf.mxu1  ;;  %v1505_v62 = vpop.f32.mrf.mxu0 }
 0x2a5   : > { %v1044_v0 = vpop.f32.mrf.mxu1 }
 0x2a6   : > { %v1051_v2 = vadd.f32 %v1044_v0, %v993_v63 }
 0x2a7   : > { %v1510_v4 = vpop.f32.mrf.mxu1 }
 0x2a8   : > { %v1060_v7 = vadd.f32 %v1410_v1, %v1051_v2 }
 0x2a9   : > { %v1047_v8 = vpop.f32.mrf.mxu1 }
 0x2aa   : > { %v1052_v9 = vadd.f32 %v1047_v8, %v996_v5  ;;  %v1062_v12 = vmax.f32 %v1060_v7, 0.0 }
 0x2ab   : > { %v1511_v11 = vpop.f32.mrf.mxu1 }
 0x2ac   : > { %v1061_v13 = vadd.f32 %v1410_v1, %v1052_v9  ;;  %v1067_v15 = vrot.slane %v1062_v12, 4  ;;  %v1076_v16 = vrot.slane %v1062_v12, 6 }
 0x2ae   : > { %v1063_v14 = vmax.f32 %v1061_v13, 0.0 }
 0x2b0   : > { %v1068_v17 = vrot.slane %v1063_v14, 4  ;;  %v1077_v18 = vrot.slane %v1063_v14, 6 }
 0x2b2   : > { %v1070_v19 = vsel %vm884_vm9, %v1068_v17, %v1067_v15  ;;  %v1079_v20 = vsel %vm466_vm5, %v1077_v18, %v1076_v16  ;;  %v1069_v23 = vsel %vm884_vm9, %v1067_v15, %v1068_v17  ;;  %v1078_v24 = vsel %vm466_vm5, %v1076_v16, %v1077_v18 }
 0x2b3   : > { %v1071_v21 = vmul.f32 %v1390_v38, %v1070_v19  ;;  %v1080_v22 = vmul.f32 %v1805_v10, %v1079_v20  ;;  %v1064_v10 = vpack.c.bf16 %v1063_v14, %v1062_v12 }
 0x2b5   : > { %v1082_v26 = vpack.c.bf16 %v1078_v24, %v1080_v22  ;;  %v1073_v27 = vpack.c.bf16 %v1069_v23, %v1071_v21 }
 0x2b7   : > { %1515 = vmatmul.mubr.msk.bf16.vlgmr.msra.gmra.mxu0 %vm663_vm7, %v1082_v26  ;;  %1521 = vmatmul.mubr.msk.bf16.vlgmr.msra.gmra.mxu1 %vm663_vm7, %v1073_v27 }
 0x2b8   : > { %1525 = vmatpush3.bf16.msra.mxu0 %v1585_v25  ;;  %1526 = vmatprep.mubr.msk.bf16.mxu0 %vm1654_vm1, %v1653_v3 }
 0x2b9   : > { %1532 = vmatprep.mubr.msk.bf16.mxu1 %vm1654_vm1, %v1653_v3  ;;  %1531 = vmatpush3.bf16.msra.mxu1 %v1586_v6 }
 0x2bf   : > { %1527 = vmatmul.mubr.msk.bf16.vlgmr.msra.gmra.mxu0 %vm663_vm7, %v1064_v10 }
 0x377   : > { %v1126_v28 = vpop.f32.mrf.mxu0  ;;  %v1175_v29 = vpop.f32.mrf.mxu1 }
 0x379   : > { %v1516_v30 = vpop.f32.mrf.mxu0  ;;  %v1522_v31 = vpop.f32.mrf.mxu1 }
 0x37b   : > { %v1128_v32 = vpop.f32.mrf.mxu0  ;;  %v1177_v33 = vpop.f32.mrf.mxu1 }
 0x37c   : > { %v1178_v39 = vadd.f32 %v1177_v33, %v1128_v32 }
 0x37d   : > { %v1517_v34 = vpop.f32.mrf.mxu0  ;;  %v1523_v35 = vpop.f32.mrf.mxu1 }
 0x37f   : > { %v1226_v36 = vpop.f32.mrf.mxu0 }
 0x381   : > { %v1528_v38 = vpop.f32.mrf.mxu0 }
 0x383   : > { %v1228_v3 = vpop.f32.mrf.mxu0 }
 0x384   : > { %v1232_v41 = vadd.f32 %v1228_v3, %v1178_v39 }
 0x385   : > { %v1529_v42 = vpop.f32.mrf.mxu0 }
 0x386   : > { %v1240_v43 = vadd.f32 %v1417_v40, %v1232_v41 }
 0x388   : > { %v1241_v44 = vmax.f32 %v1240_v43, 0.0 }
 0x38a   : > { %v1242_v45 = vadd.f32 %v1241_v44, %v1888_v37 }
 0x38c   : > { %v1243_v46 = vmax.f32 %v1242_v45, 0.0 }
 0x38e   : > { %v1244_v47 = vpack.c.bf16 %v1243_v46, %v1243_v46 }
 0x390   : > { %v1249_v48 = vshrl.u32 %v1244_v47, 16 }
 0x392   : > { %v1251_v49 = vrot.slane %v1249_v48, 3 }
 0x394   : > { %1533 = vmatmul.mubr.msk.bf16.vlgmr.msra.gmra.mxu1 %vm663_vm7, %v1251_v49 }
 0x454   : > { %v1295_v51 = vpop.f32.mrf.mxu1 }
 0x455   : > { %v1296_v52 = vadd.f32 %v1295_v51, %v1247_v50 }
 0x456   : > { %v1534_v53 = vpop.f32.mrf.mxu1 }
 0x457   : > { %v1302_v54 = vsel %vm1301_vm10, %v1296_v52, -inf }
 0x458   : > { %1303 = vmax.xlane.f32.xlu0 %v1302_v54  ;;  %v1298_v37 = vpop.f32.mrf.mxu1 }
 0x45a   : > { %v1535_v55 = vpop.f32.mrf.mxu1 }
 0x4e1   : > { %v1304_v56 = vpop.xlane.xlu0 %1303 }
 0x4e2   : > { %v1305_v57 = vsub.f32 %v1296_v52, %v1304_v56 }
 0x4e4   : > { %v1306_v58 = vmul.f32 1.442695, %v1305_v57 }
 0x4e6   : > { %1587 = vpow2.f32 %v1306_v58 }
 0x4f3   : > { %v1588_v59 = vpop.eup %1587 }
 0x4f4   : > { %v1308_v60 = vsel %vm1301_vm10, %v1588_v59, 0.0 }
 0x4f5   : > { %1309 = vadd.xlane.f32.xlu0 %v1308_v60 }
 0x57e   : > { %v1310_v61 = vpop.xlane.xlu0 %1309 }
 0x57f   : > { %1589 = vrcp.f32 %v1310_v61 }
 0x58c   : > { %v1590_v62 = vpop.eup %1589 }
 0x58d   : > { %v1312_v63 = vmul.f32 %v1590_v62, %v1588_v59 }
 0x58f   : > { %1313 = vst.msk [vmem:[%s432_s16] sm:$0x1] %vm1301_vm10, %v1312_v63 }
 0x590   : > { %1604 = shalt.err (!%p1601_p3)
}
 0x591   : > { %s1605_s21 = scalar_lea.hbm %s1325_s23, 16  ;;  %s1609_s16 = scalar_lea.hbm %s2008_s13, 32 }
 0x592   : > { %p1606_p4 = scmp.ne.s32.totalorder %s1325_s23, %s1605_s21  ;;  %p1610_p9 = scmp.lt.s32.totalorder %s1325_s23, %s2008_s13 }
 0x593   : > { %p1611_p10 = scmp.lt.s32.totalorder %s1609_s16, %s1605_s21 }
 0x594   : > { %p1607_p7 = pnand %p1606_p4, %p1764_p5 }
 0x595   : > { %p1612_p11 = por %p1611_p10, %p1610_p9 }
 0x596   : > { %p1608_p8 = pneg %p1607_p7 }
 0x598   : > { %p1613_p12 = pnand %p1612_p11, %p1608_p8 }
 0x59a   : > { %1616 = shalt.err (!%p1613_p12)
}
 0x59b   : > { %1536 = dma.vmem_to_hbm [thread:$0]  (%p1764_p5), %s1328_s20, 16, %s1325_s23, %s1315_s24  }
 0x59c PF: > { %p1542_p13 = scmp.ge.s32.totalorder %s1651_s28, 2  ;;  %s1339_s0 = sand.u32 1, %s1639_s25  }
 0x59d   : > { %s1340_s1 = scalar_lea.sflag [#allocation3], %s1339_s0 }
 0x59e   : > { %p1539_p0 = pnand %p1542_p13, %p1768_p6 }
 0x5a0   : > { %p1540_p1 = pneg %p1539_p0 }
 0x5a2   : > { %1634 = dma.done.wait (%p1540_p1), %s1340_s1, 16  }
 0x5a3   : > { %1636 = vsyncadd (%p1540_p1), %s1340_s1, 4294967280  ;;  %p23_p2 = scmp.ge.s32.totalorder %s1751_s14, 4   ;;  %s2019_s25 = smov %s1643_s26 }
 0x5a4   : > { %s2020_s26 = smov %s1647_s27  ;;  %s2021_s27 = smov %s1762_s17 }
 0x5a5   : > { %s2022_s28 = smov %s1751_s14  ;;  %25 = sbr.rel (!%p23_p2) target bundleno = 8 (0x8), region = 107 }
 0x5aa   :  { %1344 = vsyncpa [#allocation3], 1 }
 0x5ab   :  { %1346 = vsyncpa [#allocation3 + $0x1], 1 }

</bundles_post_ra>
